<compile_context>
chip_gen: v7x
topology: tpu7x:2x2x1
jax: 0.10.0
libtpu: 0.0.40
codegen_flags: <defaults>
</compile_context>

<pallas_src>
import jax
import jax.numpy as jnp
from jax.experimental import pallas as pl
from jax.experimental.pallas import tpu as pltpu

_LANE = 128
_MIB = 1024 * 1024

# None = unknown, True/False after the first kernel build (records whether this jax
# build accepts pipeline_mode=pl.Buffered(1) on grid-invariant weight BlockSpecs).
_WEIGHT_SINGLE_BUFFER_OK = None


def _hardswish(x):
    # nn.Hardswish: x * relu6(x + 3) / 6
    return x * jnp.clip(x + 3.0, 0.0, 6.0) * (1.0 / 6.0)


def critic_adv_kernel(x_ref,
                      w1_ref, b1_ref,
                      w2_ref, b2_ref,
                      w3_ref, b3_ref,
                      w4_ref, b4_ref,
                      o_ref):
    wd = w1_ref.dtype                 # dtype fed to the MXU (bf16 by default, or f32)

    x = x_ref[...].astype(wd)

    # Linear(state_dim, mid) + ReLU   (f32 accumulation on the MXU)
    h = jnp.dot(x, w1_ref[...], preferred_element_type=jnp.float32) + b1_ref[...]
    h = jnp.maximum(h, 0.0)

    # Linear(mid, mid) + ReLU
    h = jnp.dot(h.astype(wd), w2_ref[...],
                preferred_element_type=jnp.float32) + b2_ref[...]
    h = jnp.maximum(h, 0.0)

    # Linear(mid, mid) + Hardswish    (elementwise path stays f32 -- v5e has no bf16 VPU)
    h = jnp.dot(h.astype(wd), w3_ref[...],
                preferred_element_type=jnp.float32) + b3_ref[...]
    h = _hardswish(h)

    # Linear(mid, 1): contract w4_row (1, mid) with h (tb, mid) over mid -> (1, tb).
    # Same contraction pattern as q@k.T (both last dims contracted): lane-dense
    # result, unmasked full-width store, no XLU transpose of h.
    o_row = jax.lax.dot_general(
        w4_ref[...], h.astype(wd),
        dimension_numbers=(((1,), (1,)), ((), ())),
        preferred_element_type=jnp.float32)
    o_ref[...] = (o_row + b4_ref[0]).astype(o_ref.dtype)


def _round_up(n, m):
    return ((n + m - 1) // m) * m


def _pad2(a, rows, cols):
    r, c = a.shape
    return jnp.pad(a, ((0, rows - r), (0, cols - c)))


def init_params(key, state_dim, mid_dim):
    """PyTorch-Linear-style init (uniform +-1/sqrt(fan_in)).
    Weights stored transposed: (in_dim, out_dim)."""
    ks = jax.random.split(key, 8)

    def lin(kw, kb, fan_in, fan_out):
        bound = 1.0 / jnp.sqrt(fan_in)
        w = jax.random.uniform(kw, (fan_in, fan_out), jnp.float32, -bound, bound)
        b = jax.random.uniform(kb, (1, fan_out), jnp.float32, -bound, bound)
        return w, b

    w1, b1 = lin(ks[0], ks[1], state_dim, mid_dim)
    w2, b2 = lin(ks[2], ks[3], mid_dim, mid_dim)
    w3, b3 = lin(ks[4], ks[5], mid_dim, mid_dim)
    w4, b4 = lin(ks[6], ks[7], mid_dim, 1)
    return dict(w1=w1, b1=b1, w2=w2, b2=b2, w3=w3, b3=b3, w4=w4, b4=b4)


def prepare_params(params, *, lane_multiple=_LANE, weight_dtype=jnp.bfloat16):
    """Zero-pad weight OUTPUT dims to lane multiples (once, wrapper-side).
    w1's K dim stays at the raw state_dim (block == full dim is legal), so the
    state tensor itself never needs padding.  Weights default to bf16 (MXU-input
    dtype); biases stay f32.  Padding is exact: padded rows/cols and biases are 0
    and ReLU(0) = Hardswish(0) = 0, so padded channels never affect the output."""
    state_dim, mid_dim = params["w1"].shape
    mp = _round_up(mid_dim, lane_multiple)
    wd = weight_dtype
    return dict(
        w1=_pad2(params["w1"], state_dim, mp).astype(wd),   # K unpadded, N -> mp
        b1=_pad2(params["b1"], 1, mp).astype(jnp.float32),
        w2=_pad2(params["w2"], mp, mp).astype(wd),
        b2=_pad2(params["b2"], 1, mp).astype(jnp.float32),
        w3=_pad2(params["w3"], mp, mp).astype(wd),
        b3=_pad2(params["b3"], 1, mp).astype(jnp.float32),
        # Layer-4 weight as a lane-dense row (1, mid), contracted against h's lanes.
        w4=_pad2(params["w4"].T, 1, mp).astype(wd),
        b4=params["b4"].reshape(1).astype(jnp.float32),      # single scalar -> SMEM
        state_dim=state_dim,
        mid_dim=mid_dim,
    )


def _vmem_capacity_bytes():
    """Physical VMEM of the attached TPU; conservative (v7x) fallback if unknown."""
    try:
        info = pltpu.get_tpu_info()
        for attr in ("vmem_capacity_bytes", "vmem_size_bytes", "vmem_bytes"):
            v = getattr(info, attr, None)
            if v:
                return int(v)
    except Exception:
        pass
    return 64 * _MIB


def _pick_batch_tile(batch, tb_max):
    """Returns (batch_tile, padded_batch).  Guarantees >= 2 grid steps whenever
    batch > 128 (so v7x's 2 TensorCores both get work via the 'parallel' axis),
    and never returns an unbounded tb == batch for large batches."""
    if batch <= _LANE:
        return batch, batch                      # single small block, no pad
    pb = _round_up(batch, _LANE)
    for tb in (1024, 512, 256, 128):
        if tb <= tb_max and pb % tb == 0 and pb // tb >= 2:
            return tb, pb
    return _LANE, pb


def _vmem_estimate(tb, sd, mp, weight_bytes, single_buffer_weights):
    wbuf = 1 if single_buffer_weights else 2
    weights = wbuf * ((sd * mp + 2 * mp * mp + mp) * weight_bytes + 3 * mp * 4)
    x_io = 2 * tb * sd * 4                       # x tile, double-buffered
    out_io = 2 * tb * 4                          # (1, tb) output row, double-buffered
    acts = 3 * tb * mp * 4                       # f32 intermediate activations
    return weights + x_io + out_io + acts


def _vmem_limit_bytes(tb, sd, mp, weight_bytes, capacity, single_buffer_weights):
    est = _vmem_estimate(tb, sd, mp, weight_bytes, single_buffer_weights)
    est = int(est * 1.25) + 4 * _MIB             # modest headroom for compiler temps
    cap = capacity - 8 * _MIB                    # never request over physical VMEM
    floor = min(32 * _MIB, cap)
    return int(max(min(est, cap), floor))


def critic_adv_forward(state, prepared, *, batch_tile=None):
    """state: (B, state_dim) f32.  prepared: output of prepare_params().  -> (B, 1)."""
    global _WEIGHT_SINGLE_BUFFER_OK

    batch, state_dim = state.shape
    assert state_dim == prepared["state_dim"], "state width mismatch with params"
    sd, mp = prepared["w1"].shape                 # sd == raw state_dim (unpadded K)
    weight_bytes = jnp.dtype(prepared["w1"].dtype).itemsize

    capacity = _vmem_capacity_bytes()
    cap = capacity - 8 * _MIB
    tb_max = 1024 if capacity >= 96 * _MIB else 512   # bigger tiles on 128-MiB chips

    if batch_tile is None:
        tb, pb = _pick_batch_tile(batch, tb_max)
    else:
        tb = batch_tile
        pb = _round_up(batch, tb) if tb != batch else batch
        assert tb == pb or tb % _LANE == 0, (
            "batch_tile must equal the (padded) batch or be a multiple of 128; "
            f"got batch={batch}, batch_tile={tb}")

    # Shrink the batch tile until the VMEM estimate fits physical capacity (v7x: 64 MiB).
    while tb > _LANE and pb % (tb // 2) == 0 and \
            _vmem_estimate(tb, sd, mp, weight_bytes, True) > cap:
        tb //= 2
    if _vmem_estimate(min(tb, _LANE), sd, mp, weight_bytes, True) > cap:
        # TODO(synk): add a K/N grid axis (or emit_pipeline) over w2/w3 column blocks
        # for mid_dim configurations whose weights alone exceed VMEM.
        raise ValueError(
            f"CriticAdv weights do not fit VMEM ({capacity // _MIB} MiB) at "
            f"mid_dim(padded)={mp} with {weight_bytes}-byte weights; use bf16/fp8 "
            "weights or a smaller mid_dim.")

    if pb != batch:
        state = jnp.pad(state, ((0, pb - batch), (0, 0)))   # pad batch only if needed
    grid = (pb // tb,)

    flops = 2 * pb * (sd * mp + 2 * mp * mp + mp)
    bytes_accessed = (pb * sd * 4 + pb * 4
                      + (sd * mp + 2 * mp * mp + mp) * weight_bytes
                      + 3 * mp * 4 + 4)
    cost = pl.CostEstimate(flops=flops, transcendentals=0,
                           bytes_accessed=bytes_accessed)

    def build(single_buffer_weights):
        extra = ({"pipeline_mode": pl.Buffered(1)} if single_buffer_weights else {})

        def const_spec(shape):                   # grid-invariant operand, full block
            return pl.BlockSpec(shape, lambda i: (0, 0), **extra)

        return pl.pallas_call(
            critic_adv_kernel,
            out_shape=jax.ShapeDtypeStruct((1, pb), jnp.float32),
            grid=grid,
            in_specs=[
                pl.BlockSpec((tb, sd), lambda i: (i, 0)),           # x tile (pipelined)
                const_spec((sd, mp)), const_spec((1, mp)),          # layer 1
                const_spec((mp, mp)), const_spec((1, mp)),          # layer 2
                const_spec((mp, mp)), const_spec((1, mp)),          # layer 3
                const_spec((1, mp)),                                # layer 4 weight row
                pl.BlockSpec(memory_space=pltpu.MemorySpace.SMEM),  # layer 4 bias scalar
            ],
            out_specs=pl.BlockSpec((1, tb), lambda i: (0, i)),      # lane-dense row
            compiler_params=pltpu.CompilerParams(
                dimension_semantics=("parallel",),
                vmem_limit_bytes=_vmem_limit_bytes(
                    tb, sd, mp, weight_bytes, capacity, single_buffer_weights)),
            cost_estimate=cost,
        )

    args = (state,
            prepared["w1"], prepared["b1"],
            prepared["w2"], prepared["b2"],
            prepared["w3"], prepared["b3"],
            prepared["w4"], prepared["b4"])

    if _WEIGHT_SINGLE_BUFFER_OK is None:
        try:
            # Single-buffer the grid-invariant weights: their index_map never changes,
            # so one VMEM copy suffices (halves the resident weight footprint).
            out = jax.block_until_ready(build(True)(*args))
            _WEIGHT_SINGLE_BUFFER_OK = True
        except Exception:
            # pipeline_mode=pl.Buffered(1) rejected by this jax build.  Fall back to
            # default double-buffering (correct, just more weight VMEM) and record it.
            # Genuine non-pipeline_mode errors still surface: this build fails too.
            _WEIGHT_SINGLE_BUFFER_OK = False
            out = build(False)(*args)
    elif _WEIGHT_SINGLE_BUFFER_OK:
        out = build(True)(*args)
    else:
        out = build(False)(*args)

    out = out.reshape(pb, 1)
    return out[:batch] if pb != batch else out


def critic_adv_reference(state, p):
    h = jnp.maximum(state @ p["w1"] + p["b1"], 0.0)
    h = jnp.maximum(h @ p["w2"] + p["b2"], 0.0)
    h = _hardswish(h @ p["w3"] + p["b3"])
    return h @ p["w4"] + p["b4"]


def critic_adv_reference_cast(state, p, wd):
    # Same math with the kernel's MXU-input casting pattern (bf16 in, f32 accumulate).
    dot = lambda a, b: jnp.dot(a.astype(wd), b.astype(wd),
                               preferred_element_type=jnp.float32)
    h = jnp.maximum(dot(state, p["w1"]) + p["b1"], 0.0)
    h = jnp.maximum(dot(h, p["w2"]) + p["b2"], 0.0)
    h = _hardswish(dot(h, p["w3"]) + p["b3"])
    return dot(h, p["w4"]) + p["b4"]


if __name__ == "__main__":
    key = jax.random.PRNGKey(0)

    # --- Test 1: tiny shapes, f32 weights, single grid step (exact-parity path) ---
    batch, state_dim, mid_dim = 8, 16, 32
    k_state, k_params, key = jax.random.split(key, 3)
    state = jax.random.normal(k_state, (batch, state_dim), jnp.float32)
    params = init_params(k_params, state_dim, mid_dim)

    prep_f32 = prepare_params(params, weight_dtype=jnp.float32)
    out = jax.block_until_ready(critic_adv_forward(state, prep_f32))
    ref = critic_adv_reference(state, params)
    assert out.shape == (batch, 1)
    assert jnp.allclose(out, ref, atol=1e-5, rtol=1e-5), float(jnp.abs(out - ref).max())

    # --- Test 2: default bf16 MXU inputs, tiled batch (grid >= 2), non-lane state_dim ---
    batch, state_dim, mid_dim = 384, 20, 128
    k_state, k_params, key = jax.random.split(key, 3)
    state = jax.random.normal(k_state, (batch, state_dim), jnp.float32)
    params = init_params(k_params, state_dim, mid_dim)

    prep_bf16 = prepare_params(params)                      # bf16 by default
    out = jax.block_until_ready(critic_adv_forward(state, prep_bf16))
    ref_cast = critic_adv_reference_cast(state, params, jnp.bfloat16)
    assert out.shape == (batch, 1)
    assert jnp.allclose(out, ref_cast, atol=2e-2, rtol=2e-2), \
        float(jnp.abs(out - ref_cast).max())

    # --- Test 3: batch not a multiple of 128 (wrapper pads batch, slices result) ---
    batch, state_dim, mid_dim = 200, 24, 64
    k_state, k_params, key = jax.random.split(key, 3)
    state = jax.random.normal(k_state, (batch, state_dim), jnp.float32)
    params = init_params(k_params, state_dim, mid_dim)

    prep_f32 = prepare_params(params, weight_dtype=jnp.float32)
    out = jax.block_until_ready(critic_adv_forward(state, prep_f32))
    ref = critic_adv_reference(state, params)
    assert out.shape == (batch, 1)
    assert jnp.allclose(out, ref, atol=1e-4, rtol=1e-4), float(jnp.abs(out - ref).max())

    print("KERNEL_OK")
</pallas_src>

<mosaic_0001>
module attributes {stable_mosaic.version = 11 : i64} {
  func.func @critic_adv_kernel(%arg0: i32, %arg1: memref<8x16xf32, #tpu.memory_space<vmem>>, %arg2: memref<16x128xf32, #tpu.memory_space<vmem>>, %arg3: memref<1x128xf32, #tpu.memory_space<vmem>>, %arg4: memref<128x128xf32, #tpu.memory_space<vmem>>, %arg5: memref<1x128xf32, #tpu.memory_space<vmem>>, %arg6: memref<128x128xf32, #tpu.memory_space<vmem>>, %arg7: memref<1x128xf32, #tpu.memory_space<vmem>>, %arg8: memref<1x128xf32, #tpu.memory_space<vmem>>, %arg9: memref<1xf32, #tpu.memory_space<smem>>, %arg10: memref<1x8xf32, #tpu.memory_space<vmem>>) attributes {dimension_semantics = [#tpu.dimension_semantics<parallel>], iteration_bounds = array<i64: 1>, scalar_prefetch = 0 : i64, scratch_operands = 0 : i64, tpu.core_type = #tpu.core_type<tc>, window_params = [{transform_indices = @transform_0, window_bounds = array<i64: 8, 16>}, {pipeline_mode = #tpu.pipeline_mode<synchronous>, transform_indices = @transform_1, window_bounds = array<i64: 16, 128>}, {pipeline_mode = #tpu.pipeline_mode<synchronous>, transform_indices = @transform_2, window_bounds = array<i64: 1, 128>}, {pipeline_mode = #tpu.pipeline_mode<synchronous>, transform_indices = @transform_3, window_bounds = array<i64: 128, 128>}, {pipeline_mode = #tpu.pipeline_mode<synchronous>, transform_indices = @transform_4, window_bounds = array<i64: 1, 128>}, {pipeline_mode = #tpu.pipeline_mode<synchronous>, transform_indices = @transform_5, window_bounds = array<i64: 128, 128>}, {pipeline_mode = #tpu.pipeline_mode<synchronous>, transform_indices = @transform_6, window_bounds = array<i64: 1, 128>}, {pipeline_mode = #tpu.pipeline_mode<synchronous>, transform_indices = @transform_7, window_bounds = array<i64: 1, 128>}, {transform_indices = @transform_8, window_bounds = array<i64: 1>}, {transform_indices = @transform_9, window_bounds = array<i64: 1, 8>}]} {
    %c0 = arith.constant 0 : index
    %c0_0 = arith.constant 0 : index
    %0 = vector.load %arg1[%c0, %c0_0] : memref<8x16xf32, #tpu.memory_space<vmem>>, vector<8x16xf32>
    %c0_1 = arith.constant 0 : index
    %c0_2 = arith.constant 0 : index
    %1 = vector.load %arg2[%c0_1, %c0_2] : memref<16x128xf32, #tpu.memory_space<vmem>>, vector<16x128xf32>
    %cst = arith.constant dense<0.000000e+00> : vector<8x128xf32>
    %2 = tpu.matmul %0, %1, %cst {dimension_numbers = #tpu.dot_dimension_numbers<[1], [0], [0], [1], [0, 0, 1, 1], [], []>} : vector<8x16xf32>, vector<16x128xf32>, vector<8x128xf32> -> vector<8x128xf32>
    %c0_3 = arith.constant 0 : index
    %c0_4 = arith.constant 0 : index
    %3 = vector.load %arg3[%c0_3, %c0_4] : memref<1x128xf32, #tpu.memory_space<vmem>>, vector<1x128xf32>
    %4 = vector.broadcast %3 : vector<1x128xf32> to vector<8x128xf32>
    %5 = arith.addf %2, %4 : vector<8x128xf32>
    %cst_5 = arith.constant 0.000000e+00 : f32
    %6 = vector.broadcast %cst_5 : f32 to vector<8x128xf32>
    %7 = arith.maximumf %5, %6 : vector<8x128xf32>
    %c0_6 = arith.constant 0 : index
    %c0_7 = arith.constant 0 : index
    %8 = vector.load %arg4[%c0_6, %c0_7] : memref<128x128xf32, #tpu.memory_space<vmem>>, vector<128x128xf32>
    %cst_8 = arith.constant dense<0.000000e+00> : vector<8x128xf32>
    %9 = tpu.matmul %7, %8, %cst_8 {dimension_numbers = #tpu.dot_dimension_numbers<[1], [0], [0], [1], [0, 0, 1, 1], [], []>} : vector<8x128xf32>, vector<128x128xf32>, vector<8x128xf32> -> vector<8x128xf32>
    %c0_9 = arith.constant 0 : index
    %c0_10 = arith.constant 0 : index
    %10 = vector.load %arg5[%c0_9, %c0_10] : memref<1x128xf32, #tpu.memory_space<vmem>>, vector<1x128xf32>
    %11 = vector.broadcast %10 : vector<1x128xf32> to vector<8x128xf32>
    %12 = arith.addf %9, %11 : vector<8x128xf32>
    %cst_11 = arith.constant 0.000000e+00 : f32
    %13 = vector.broadcast %cst_11 : f32 to vector<8x128xf32>
    %14 = arith.maximumf %12, %13 : vector<8x128xf32>
    %c0_12 = arith.constant 0 : index
    %c0_13 = arith.constant 0 : index
    %15 = vector.load %arg6[%c0_12, %c0_13] : memref<128x128xf32, #tpu.memory_space<vmem>>, vector<128x128xf32>
    %cst_14 = arith.constant dense<0.000000e+00> : vector<8x128xf32>
    %16 = tpu.matmul %14, %15, %cst_14 {dimension_numbers = #tpu.dot_dimension_numbers<[1], [0], [0], [1], [0, 0, 1, 1], [], []>} : vector<8x128xf32>, vector<128x128xf32>, vector<8x128xf32> -> vector<8x128xf32>
    %c0_15 = arith.constant 0 : index
    %c0_16 = arith.constant 0 : index
    %17 = vector.load %arg7[%c0_15, %c0_16] : memref<1x128xf32, #tpu.memory_space<vmem>>, vector<1x128xf32>
    %18 = vector.broadcast %17 : vector<1x128xf32> to vector<8x128xf32>
    %19 = arith.addf %16, %18 : vector<8x128xf32>
    %cst_17 = arith.constant 3.000000e+00 : f32
    %20 = vector.broadcast %cst_17 : f32 to vector<8x128xf32>
    %21 = arith.addf %19, %20 : vector<8x128xf32>
    %cst_18 = arith.constant 0.000000e+00 : f32
    %cst_19 = arith.constant 6.000000e+00 : f32
    %22 = vector.broadcast %cst_18 : f32 to vector<8x128xf32>
    %23 = arith.maximumf %22, %21 : vector<8x128xf32>
    %24 = vector.broadcast %cst_19 : f32 to vector<8x128xf32>
    %25 = arith.minimumf %24, %23 : vector<8x128xf32>
    %26 = arith.mulf %19, %25 : vector<8x128xf32>
    %cst_20 = arith.constant 0.166666672 : f32
    %27 = vector.broadcast %cst_20 : f32 to vector<8x128xf32>
    %28 = arith.mulf %26, %27 : vector<8x128xf32>
    %c0_21 = arith.constant 0 : index
    %c0_22 = arith.constant 0 : index
    %29 = vector.load %arg8[%c0_21, %c0_22] : memref<1x128xf32, #tpu.memory_space<vmem>>, vector<1x128xf32>
    %cst_23 = arith.constant dense<0.000000e+00> : vector<1x8xf32>
    %30 = tpu.matmul %29, %28, %cst_23 {dimension_numbers = #tpu.dot_dimension_numbers<[1], [1], [0], [0], [0, 0, 1, 0], [], []>} : vector<1x128xf32>, vector<8x128xf32>, vector<1x8xf32> -> vector<1x8xf32>
    %c0_24 = arith.constant 0 : index
    %31 = memref.load %arg9[%c0_24] : memref<1xf32, #tpu.memory_space<smem>>
    %32 = vector.broadcast %31 : f32 to vector<1x8xf32>
    %33 = arith.addf %30, %32 : vector<1x8xf32>
    %c0_25 = arith.constant 0 : index
    %c0_26 = arith.constant 0 : index
    %34 = vector.load %arg10[%c0_25, %c0_26] : memref<1x8xf32, #tpu.memory_space<vmem>>, vector<1x8xf32>
    tpu.vector_store %arg10[%c0_25, %c0_26], %33 {strides = array<i32>} : memref<1x8xf32, #tpu.memory_space<vmem>>, vector<1x8xf32>,
    return
  }
  func.func @transform_0(%arg0: i32) -> (i32, i32) {
    %c0_i32 = arith.constant 0 : i32
    %c0_i32_0 = arith.constant 0 : i32
    return %arg0, %c0_i32 : i32, i32
  }
  func.func @transform_1(%arg0: i32) -> (i32, i32) {
    %c0_i32 = arith.constant 0 : i32
    %c0_i32_0 = arith.constant 0 : i32
    %c0_i32_1 = arith.constant 0 : i32
    return %c0_i32, %c0_i32_0 : i32, i32
  }
  func.func @transform_2(%arg0: i32) -> (i32, i32) {
    %c0_i32 = arith.constant 0 : i32
    %c0_i32_0 = arith.constant 0 : i32
    %c0_i32_1 = arith.constant 0 : i32
    return %c0_i32, %c0_i32_0 : i32, i32
  }
  func.func @transform_3(%arg0: i32) -> (i32, i32) {
    %c0_i32 = arith.constant 0 : i32
    %c0_i32_0 = arith.constant 0 : i32
    %c0_i32_1 = arith.constant 0 : i32
    return %c0_i32, %c0_i32_0 : i32, i32
  }
  func.func @transform_4(%arg0: i32) -> (i32, i32) {
    %c0_i32 = arith.constant 0 : i32
    %c0_i32_0 = arith.constant 0 : i32
    %c0_i32_1 = arith.constant 0 : i32
    return %c0_i32, %c0_i32_0 : i32, i32
  }
  func.func @transform_5(%arg0: i32) -> (i32, i32) {
    %c0_i32 = arith.constant 0 : i32
    %c0_i32_0 = arith.constant 0 : i32
    %c0_i32_1 = arith.constant 0 : i32
    return %c0_i32, %c0_i32_0 : i32, i32
  }
  func.func @transform_6(%arg0: i32) -> (i32, i32) {
    %c0_i32 = arith.constant 0 : i32
    %c0_i32_0 = arith.constant 0 : i32
    %c0_i32_1 = arith.constant 0 : i32
    return %c0_i32, %c0_i32_0 : i32, i32
  }
  func.func @transform_7(%arg0: i32) -> (i32, i32) {
    %c0_i32 = arith.constant 0 : i32
    %c0_i32_0 = arith.constant 0 : i32
    %c0_i32_1 = arith.constant 0 : i32
    return %c0_i32, %c0_i32_0 : i32, i32
  }
  func.func @transform_8(%arg0: i32) -> i32 {
    %c0_i32 = arith.constant 0 : i32
    %c0_i32_0 = arith.constant 0 : i32
    return %c0_i32 : i32
  }
  func.func @transform_9(%arg0: i32) -> (i32, i32) {
    %c0_i32 = arith.constant 0 : i32
    %c0_i32_0 = arith.constant 0 : i32
    return %c0_i32, %arg0 : i32, i32
  }
}

module attributes {stable_mosaic.version = 11 : i64} {
  func.func @critic_adv_kernel(%arg0: i32, %arg1: memref<8x16xf32, #tpu.memory_space<vmem>>, %arg2: memref<16x128xf32, #tpu.memory_space<vmem>>, %arg3: memref<1x128xf32, #tpu.memory_space<vmem>>, %arg4: memref<128x128xf32, #tpu.memory_space<vmem>>, %arg5: memref<1x128xf32, #tpu.memory_space<vmem>>, %arg6: memref<128x128xf32, #tpu.memory_space<vmem>>, %arg7: memref<1x128xf32, #tpu.memory_space<vmem>>, %arg8: memref<1x128xf32, #tpu.memory_space<vmem>>, %arg9: memref<1xf32, #tpu.memory_space<smem>>, %arg10: memref<1x8xf32, #tpu.memory_space<vmem>>) attributes {dimension_semantics = [#tpu.dimension_semantics<parallel>], iteration_bounds = array<i64: 1>, scalar_prefetch = 0 : i64, scratch_operands = 0 : i64, tpu.core_type = #tpu.core_type<tc>, window_params = [{transform_indices = @transform_0, window_bounds = array<i64: 8, 16>}, {pipeline_mode = #tpu.pipeline_mode<synchronous>, transform_indices = @transform_1, window_bounds = array<i64: 16, 128>}, {pipeline_mode = #tpu.pipeline_mode<synchronous>, transform_indices = @transform_2, window_bounds = array<i64: 1, 128>}, {pipeline_mode = #tpu.pipeline_mode<synchronous>, transform_indices = @transform_3, window_bounds = array<i64: 128, 128>}, {pipeline_mode = #tpu.pipeline_mode<synchronous>, transform_indices = @transform_4, window_bounds = array<i64: 1, 128>}, {pipeline_mode = #tpu.pipeline_mode<synchronous>, transform_indices = @transform_5, window_bounds = array<i64: 128, 128>}, {pipeline_mode = #tpu.pipeline_mode<synchronous>, transform_indices = @transform_6, window_bounds = array<i64: 1, 128>}, {pipeline_mode = #tpu.pipeline_mode<synchronous>, transform_indices = @transform_7, window_bounds = array<i64: 1, 128>}, {transform_indices = @transform_8, window_bounds = array<i64: 1>}, {transform_indices = @transform_9, window_bounds = array<i64: 1, 8>}]} {
    %c0 = arith.constant 0 : index
    %c0_0 = arith.constant 0 : index
    %0 = vector.load %arg1[%c0, %c0_0] : memref<8x16xf32, #tpu.memory_space<vmem>>, vector<8x16xf32>
    %c0_1 = arith.constant 0 : index
    %c0_2 = arith.constant 0 : index
    %1 = vector.load %arg2[%c0_1, %c0_2] : memref<16x128xf32, #tpu.memory_space<vmem>>, vector<16x128xf32>
    %cst = arith.constant dense<0.000000e+00> : vector<8x128xf32>
    %2 = tpu.matmul %0, %1, %cst {dimension_numbers = #tpu.dot_dimension_numbers<[1], [0], [0], [1], [0, 0, 1, 1], [], []>} : vector<8x16xf32>, vector<16x128xf32>, vector<8x128xf32> -> vector<8x128xf32>
    %c0_3 = arith.constant 0 : index
    %c0_4 = arith.constant 0 : index
    %3 = vector.load %arg3[%c0_3, %c0_4] : memref<1x128xf32, #tpu.memory_space<vmem>>, vector<1x128xf32>
    %4 = vector.broadcast %3 : vector<1x128xf32> to vector<8x128xf32>
    %5 = arith.addf %2, %4 : vector<8x128xf32>
    %cst_5 = arith.constant 0.000000e+00 : f32
    %6 = vector.broadcast %cst_5 : f32 to vector<8x128xf32>
    %7 = arith.maximumf %5, %6 : vector<8x128xf32>
    %c0_6 = arith.constant 0 : index
    %c0_7 = arith.constant 0 : index
    %8 = vector.load %arg4[%c0_6, %c0_7] : memref<128x128xf32, #tpu.memory_space<vmem>>, vector<128x128xf32>
    %cst_8 = arith.constant dense<0.000000e+00> : vector<8x128xf32>
    %9 = tpu.matmul %7, %8, %cst_8 {dimension_numbers = #tpu.dot_dimension_numbers<[1], [0], [0], [1], [0, 0, 1, 1], [], []>} : vector<8x128xf32>, vector<128x128xf32>, vector<8x128xf32> -> vector<8x128xf32>
    %c0_9 = arith.constant 0 : index
    %c0_10 = arith.constant 0 : index
    %10 = vector.load %arg5[%c0_9, %c0_10] : memref<1x128xf32, #tpu.memory_space<vmem>>, vector<1x128xf32>
    %11 = vector.broadcast %10 : vector<1x128xf32> to vector<8x128xf32>
    %12 = arith.addf %9, %11 : vector<8x128xf32>
    %cst_11 = arith.constant 0.000000e+00 : f32
    %13 = vector.broadcast %cst_11 : f32 to vector<8x128xf32>
    %14 = arith.maximumf %12, %13 : vector<8x128xf32>
    %c0_12 = arith.constant 0 : index
    %c0_13 = arith.constant 0 : index
    %15 = vector.load %arg6[%c0_12, %c0_13] : memref<128x128xf32, #tpu.memory_space<vmem>>, vector<128x128xf32>
    %cst_14 = arith.constant dense<0.000000e+00> : vector<8x128xf32>
    %16 = tpu.matmul %14, %15, %cst_14 {dimension_numbers = #tpu.dot_dimension_numbers<[1], [0], [0], [1], [0, 0, 1, 1], [], []>} : vector<8x128xf32>, vector<128x128xf32>, vector<8x128xf32> -> vector<8x128xf32>
    %c0_15 = arith.constant 0 : index
    %c0_16 = arith.constant 0 : index
    %17 = vector.load %arg7[%c0_15, %c0_16] : memref<1x128xf32, #tpu.memory_space<vmem>>, vector<1x128xf32>
    %18 = vector.broadcast %17 : vector<1x128xf32> to vector<8x128xf32>
    %19 = arith.addf %16, %18 : vector<8x128xf32>
    %cst_17 = arith.constant 3.000000e+00 : f32
    %20 = vector.broadcast %cst_17 : f32 to vector<8x128xf32>
    %21 = arith.addf %19, %20 : vector<8x128xf32>
    %cst_18 = arith.constant 0.000000e+00 : f32
    %cst_19 = arith.constant 6.000000e+00 : f32
    %22 = vector.broadcast %cst_18 : f32 to vector<8x128xf32>
    %23 = arith.maximumf %22, %21 : vector<8x128xf32>
    %24 = vector.broadcast %cst_19 : f32 to vector<8x128xf32>
    %25 = arith.minimumf %24, %23 : vector<8x128xf32>
    %26 = arith.mulf %19, %25 : vector<8x128xf32>
    %cst_20 = arith.constant 0.166666672 : f32
    %27 = vector.broadcast %cst_20 : f32 to vector<8x128xf32>
    %28 = arith.mulf %26, %27 : vector<8x128xf32>
    %c0_21 = arith.constant 0 : index
    %c0_22 = arith.constant 0 : index
    %29 = vector.load %arg8[%c0_21, %c0_22] : memref<1x128xf32, #tpu.memory_space<vmem>>, vector<1x128xf32>
    %cst_23 = arith.constant dense<0.000000e+00> : vector<1x8xf32>
    %30 = tpu.matmul %29, %28, %cst_23 {dimension_numbers = #tpu.dot_dimension_numbers<[1], [1], [0], [0], [0, 0, 1, 0], [], []>} : vector<1x128xf32>, vector<8x128xf32>, vector<1x8xf32> -> vector<1x8xf32>
    %c0_24 = arith.constant 0 : index
    %31 = memref.load %arg9[%c0_24] : memref<1xf32, #tpu.memory_space<smem>>
    %32 = vector.broadcast %31 : f32 to vector<1x8xf32>
    %33 = arith.addf %30, %32 : vector<1x8xf32>
    %c0_25 = arith.constant 0 : index
    %c0_26 = arith.constant 0 : index
    %34 = vector.load %arg10[%c0_25, %c0_26] : memref<1x8xf32, #tpu.memory_space<vmem>>, vector<1x8xf32>
    tpu.vector_store %arg10[%c0_25, %c0_26], %33 {strides = array<i32>} : memref<1x8xf32, #tpu.memory_space<vmem>>, vector<1x8xf32>,
    return
  }
  func.func @transform_0(%arg0: i32) -> (i32, i32) {
    %c0_i32 = arith.constant 0 : i32
    %c0_i32_0 = arith.constant 0 : i32
    return %arg0, %c0_i32 : i32, i32
  }
  func.func @transform_1(%arg0: i32) -> (i32, i32) {
    %c0_i32 = arith.constant 0 : i32
    %c0_i32_0 = arith.constant 0 : i32
    %c0_i32_1 = arith.constant 0 : i32
    return %c0_i32, %c0_i32_0 : i32, i32
  }
  func.func @transform_2(%arg0: i32) -> (i32, i32) {
    %c0_i32 = arith.constant 0 : i32
    %c0_i32_0 = arith.constant 0 : i32
    %c0_i32_1 = arith.constant 0 : i32
    return %c0_i32, %c0_i32_0 : i32, i32
  }
  func.func @transform_3(%arg0: i32) -> (i32, i32) {
    %c0_i32 = arith.constant 0 : i32
    %c0_i32_0 = arith.constant 0 : i32
    %c0_i32_1 = arith.constant 0 : i32
    return %c0_i32, %c0_i32_0 : i32, i32
  }
  func.func @transform_4(%arg0: i32) -> (i32, i32) {
    %c0_i32 = arith.constant 0 : i32
    %c0_i32_0 = arith.constant 0 : i32
    %c0_i32_1 = arith.constant 0 : i32
    return %c0_i32, %c0_i32_0 : i32, i32
  }
  func.func @transform_5(%arg0: i32) -> (i32, i32) {
    %c0_i32 = arith.constant 0 : i32
    %c0_i32_0 = arith.constant 0 : i32
    %c0_i32_1 = arith.constant 0 : i32
    return %c0_i32, %c0_i32_0 : i32, i32
  }
  func.func @transform_6(%arg0: i32) -> (i32, i32) {
    %c0_i32 = arith.constant 0 : i32
    %c0_i32_0 = arith.constant 0 : i32
    %c0_i32_1 = arith.constant 0 : i32
    return %c0_i32, %c0_i32_0 : i32, i32
  }
  func.func @transform_7(%arg0: i32) -> (i32, i32) {
    %c0_i32 = arith.constant 0 : i32
    %c0_i32_0 = arith.constant 0 : i32
    %c0_i32_1 = arith.constant 0 : i32
    return %c0_i32, %c0_i32_0 : i32, i32
  }
  func.func @transform_8(%arg0: i32) -> i32 {
    %c0_i32 = arith.constant 0 : i32
    %c0_i32_0 = arith.constant 0 : i32
    return %c0_i32 : i32
  }
  func.func @transform_9(%arg0: i32) -> (i32, i32) {
    %c0_i32 = arith.constant 0 : i32
    %c0_i32_0 = arith.constant 0 : i32
    return %c0_i32, %arg0 : i32, i32
  }
}

</mosaic_0001>

<bundles_post_ra>
// kernel: tpu_custom_call.1
= control target key start
LH: loop header
LB: loop body
LE: loop exit
PB: predicated region body
PF: predicated region fallthrough
CT: control target
= control target key end

     0   :  { %15 = vsyncpa [#allocation4], 0  ;;  %s930_s0 = inlined_call_operand.hbm [shape: f32[8,16], index: 0, kind: input, shape index: {}]   ;;  %s931_s1 = inlined_call_operand.hbm [shape: f32[16,128], index: 1, kind: input, shape index: {}]   ;;  %s932_s2 = inlined_call_operand.vmem [shape: f32[1,128], index: 2, kind: input, shape index: {}]   ;;  %s933_s3 = inlined_call_operand.hbm [shape: f32[128,128], index: 3, kind: input, shape index: {}]   ;;  %s934_s4 = inlined_call_operand.vmem [shape: f32[1,128], index: 4, kind: input, shape index: {}]   ;;  %s935_s5 = inlined_call_operand.hbm [shape: f32[128,128], index: 5, kind: input, shape index: {}]   ;;  %s936_s6 = inlined_call_operand.vmem [shape: f32[1,128], index: 6, kind: input, shape index: {}]   ;;  %s937_s7 = inlined_call_operand.vmem [shape: f32[1,128], index: 7, kind: input, shape index: {}]   ;;  %s938_s8 = inlined_call_operand.<no memory space> [shape: f32[1], index: 8, kind: input, shape index: {}]   ;;  %s939_s9 = inlined_call_operand.hbm [shape: f32[1,8], index: 9, kind: output, shape index: {}]  }
   0x1   :  { %16 = vsyncpa [#allocation7], 0 }
   0x2   :  { %17 = vsyncpa [#allocation10], 0 }
   0x3   :  { %18 = vsyncpa [#allocation5], 0  ;;  %s760_s30 = smov [#allocation6]   ;;  %s642_s13 = scalar_lea.hbm %s931_s1, 256 }
   0x4   :  { %s34_s10 = sshll.u32 %s760_s30, 4  ;;  %p643_p0 = scmp.ne.s32.totalorder %s931_s1, %s642_s13  ;;  %s35_s10 = int_to_ptr.vmem [resolvable:$true] %s34_s10 }
   0x5   :  { %p646_p1 = scmp.lt.u32.totalorder %s642_s13, %s931_s1 }
   0x7   :  { %p648_p2 = pnand %p646_p1, %p643_p0 }
   0x9   :  { %651 = shalt.err (!%p648_p2)
}
   0xa   :  { %s652_s18 = scalar_lea.vmem %s35_s10, 256  ;;  %p657_p4 = scmp.lt.s32.totalorder %s35_s10, %s35_s10 }
   0xb   :  { %p653_p3 = scmp.ne.s32.totalorder %s35_s10, %s652_s18  ;;  %p658_p5 = scmp.lt.s32.totalorder %s652_s18, %s652_s18 }
   0xd   :  { %p659_p6 = por %p658_p5, %p657_p4 }
   0xf   :  { %p660_p7 = pnand %p659_p6, %p653_p3 }
  0x11   :  { %663 = shalt.err (!%p660_p7)
}
  0x12   :  { %s761_s19 = smov 128   ;;  %s762_s20 = smov 8  }
  0x13   :  { %40 = dma.hbm_to_vmem [thread:$0]  %s931_s1, 256, %s35_s10, [#allocation7], %s761_s19, %s761_s19, %s762_s20  }
  0x14   :  { %s763_s23 = smov [#allocation3]   ;;  %s764_s25 = smov [#allocation8]  }
  0x15   :  { %s25_s24 = sshll.u32 %s763_s23, 4  ;;  %s48_s26 = sshll.u32 %s764_s25, 4  ;;  %s26_s24 = int_to_ptr.vmem [resolvable:$true] %s25_s24  ;;  %s49_s26 = int_to_ptr.vmem [resolvable:$true] %s48_s26 }
  0x16   :  { %s664_s29 = scalar_lea.hbm %s930_s0, 128 }
  0x17   :  { %p665_p8 = scmp.ne.s32.totalorder %s930_s0, %s664_s29  ;;  %p668_p9 = scmp.lt.u32.totalorder %s664_s29, %s930_s0 }
  0x19   :  { %p670_p10 = pnand %p668_p9, %p665_p8 }
  0x1b   :  { %673 = shalt.err (!%p670_p10)
}
  0x1c   :  { %s674_s1 = scalar_lea.vmem %s26_s24, 128  ;;  %p679_p12 = scmp.lt.s32.totalorder %s26_s24, %s26_s24 }
  0x1d   :  { %p675_p11 = scmp.ne.s32.totalorder %s26_s24, %s674_s1  ;;  %p680_p13 = scmp.lt.s32.totalorder %s674_s1, %s674_s1 }
  0x1f   :  { %p681_p0 = por %p680_p13, %p679_p12 }
  0x21   :  { %p682_p1 = pnand %p681_p0, %p675_p11 }
  0x23   :  { %685 = shalt.err (!%p682_p1)
}
  0x24   :  { %28 = dma.hbm_to_vmem [thread:$0]  %s930_s0, 128, %s26_s24, [#allocation4]  }
  0x25   :  { %s686_s17 = scalar_lea.hbm %s933_s3, 2048 }
  0x26   :  { %p687_p2 = scmp.ne.s32.totalorder %s933_s3, %s686_s17  ;;  %p690_p3 = scmp.lt.u32.totalorder %s686_s17, %s933_s3 }
  0x28   :  { %p692_p4 = pnand %p690_p3, %p687_p2 }
  0x2a   :  { %695 = shalt.err (!%p692_p4)
}
  0x2b   :  { %s696_s25 = scalar_lea.vmem %s49_s26, 2048  ;;  %p701_p6 = scmp.lt.s32.totalorder %s49_s26, %s49_s26 }
  0x2c   :  { %p697_p5 = scmp.ne.s32.totalorder %s49_s26, %s696_s25  ;;  %p702_p7 = scmp.lt.s32.totalorder %s696_s25, %s696_s25 }
  0x2e   :  { %p703_p8 = por %p702_p7, %p701_p6 }
  0x30   :  { %p704_p9 = pnand %p703_p8, %p697_p5 }
  0x32   :  { %707 = shalt.err (!%p704_p9)
}
  0x33   :  { %54 = dma.hbm_to_vmem [thread:$0]  %s933_s3, 2048, %s49_s26, [#allocation7], %s761_s19, %s761_s19, %s762_s20  }
  0x34   :  { %s765_s27 = smov [#allocation9]   ;;  %s708_s11 = scalar_lea.hbm %s935_s5, 2048 }
  0x35   :  { %s62_s28 = sshll.u32 %s765_s27, 4  ;;  %p709_p10 = scmp.ne.s32.totalorder %s935_s5, %s708_s11  ;;  %s63_s28 = int_to_ptr.vmem [resolvable:$true] %s62_s28 }
  0x36   :  { %p712_p11 = scmp.lt.u32.totalorder %s708_s11, %s935_s5 }
  0x38   :  { %p714_p12 = pnand %p712_p11, %p709_p10 }
  0x3a   :  { %717 = shalt.err (!%p714_p12)
}
  0x3b   :  { %s718_s14 = scalar_lea.vmem %s63_s28, 2048  ;;  %p723_p0 = scmp.lt.s32.totalorder %s63_s28, %s63_s28 }
  0x3c   :  { %p719_p13 = scmp.ne.s32.totalorder %s63_s28, %s718_s14  ;;  %p724_p1 = scmp.lt.s32.totalorder %s718_s14, %s718_s14 }
  0x3e   :  { %p725_p2 = por %p724_p1, %p723_p0 }
  0x40   :  { %p726_p3 = pnand %p725_p2, %p719_p13 }
  0x42   :  { %729 = shalt.err (!%p726_p3)
}
  0x43   :  { %68 = dma.hbm_to_vmem [thread:$0]  %s935_s5, 2048, %s63_s28, [#allocation10], %s761_s19, %s761_s19, %s762_s20  }
  0x44   :  { %752 = dma.done.wait [#allocation4], 128  }
  0x45   :  { %753 = vsyncadd [#allocation4], 4294967168 }
  0x46   :  { %754 = dma.done.wait [#allocation7], 2304  }
  0x47   :  { %755 = vsyncadd [#allocation7], 4294964992 }
  0x48   :  { %756 = dma.done.wait [#allocation10], 2048  }
  0x49   :  { %757 = vsyncadd [#allocation10], 4294965248  ;;  %v766_v0 = vmov 0.0|0.0   ;;  %vm767_vm0 = vmmov 0   ;;  %v768_v1 = vmov 0.0   ;;  %v88_v2 = vld [vmem:[#allocation6] sm:$0xff] }
  0x4a   :  { %581 = vmatprep.subr.bf16.mxu0 %v766_v0  ;;  %503 = vmatprep.mubr.msk.f32.mxu0 %vm767_vm0, %v768_v1  ;;  %v89_v3 = vld [vmem:[#allocation6 + $0x8] sm:$0xff]  ;;  %v172_v5 = vld [vmem:[#allocation8] sm:$0xff]  ;;  %v173_v6 = vld [vmem:[#allocation8 + $0x8] sm:$0xff]  ;;  %vm97_vm1 = vcmask 130048   ;;  %s769_s22 = smov [#allocation11]   ;;  %vm437_vm2 = vcmask 57344  }
  0x4b   :  { %584 = vmatprep.subr.bf16.mxu1 %v766_v0  ;;  %538 = vmatprep.mubr.msk.f32.mxu1 %vm767_vm0, %v768_v1  ;;  %v582_v4 = vpack.c.bf16 %v89_v3, %v88_v2  ;;  %v174_v7 = vld [vmem:[#allocation8 + $0x10] sm:$0xff]  ;;  %v585_v8 = vpack.c.bf16 %v173_v6, %v172_v5  ;;  %v175_v9 = vld [vmem:[#allocation8 + $0x18] sm:$0xff]  ;;  %v87_v10 = vld [vmem:[#allocation3] sm:$0xff] }
  0x4c   :  { %v588_v11 = vpack.c.bf16 %v175_v9, %v174_v7  ;;  %v176_v12 = vld [vmem:[#allocation8 + $0x20] sm:$0xff]  ;;  %v177_v13 = vld [vmem:[#allocation8 + $0x28] sm:$0xff]  ;;  %v178_v15 = vld [vmem:[#allocation8 + $0x30] sm:$0xff] }
  0x4d   :  { %583 = vmatpush3.bf16.msra.mxu0 %v582_v4  ;;  %586 = vmatpush3.bf16.msra.mxu1 %v585_v8  ;;  %v591_v14 = vpack.c.bf16 %v177_v13, %v176_v12  ;;  %v179_v16 = vld [vmem:[#allocation8 + $0x38] sm:$0xff]  ;;  %v180_v18 = vld [vmem:[#allocation8 + $0x40] sm:$0xff]  ;;  %v181_v19 = vld [vmem:[#allocation8 + $0x48] sm:$0xff] }
  0x4e   :  { %608 = vmatprep.subr.bf16.mxu0 %v766_v0  ;;  %587 = vmatprep.subr.bf16.mxu1 %v766_v0  ;;  %v594_v17 = vpack.c.bf16 %v179_v16, %v178_v15  ;;  %v597_v20 = vpack.c.bf16 %v181_v19, %v180_v18  ;;  %v182_v21 = vld [vmem:[#allocation8 + $0x50] sm:$0xff]  ;;  %v183_v22 = vld [vmem:[#allocation8 + $0x58] sm:$0xff]  ;;  %v184_v24 = vld [vmem:[#allocation8 + $0x60] sm:$0xff] }
  0x4f   :  { %v600_v23 = vpack.c.bf16 %v183_v22, %v182_v21  ;;  %v185_v25 = vld [vmem:[#allocation8 + $0x68] sm:$0xff]  ;;  %v186_v27 = vld [vmem:[#allocation8 + $0x70] sm:$0xff]  ;;  %v187_v28 = vld [vmem:[#allocation8 + $0x78] sm:$0xff] }
  0x50   :  { %504 = vmatmul.mubr.msk.f32.vlgmr.msra.gmra.mrb[0].mxu0 %vm97_vm1, %v87_v10  ;;  %v603_v26 = vpack.c.bf16 %v185_v25, %v184_v24  ;;  %v606_v29 = vpack.c.bf16 %v187_v28, %v186_v27  ;;  %v266_v30 = vld [vmem:[#allocation9] sm:$0xff]  ;;  %v267_v31 = vld [vmem:[#allocation9 + $0x8] sm:$0xff]  ;;  %v268_v32 = vld [vmem:[#allocation9 + $0x10] sm:$0xff]  ;;  %v366_v10 = vstv %s938_s8 }
  0x51   :  { %573 = vmatprep.mubr.msk.f32.mxu0 %vm767_vm0, %v768_v1  ;;  %589 = vmatpush3.bf16.msra.mxu1 %v588_v11  ;;  %v609_v33 = vpack.c.bf16 %v267_v31, %v266_v30  ;;  %v269_v34 = vld [vmem:[#allocation9 + $0x18] sm:$0xff]  ;;  %v270_v36 = vld [vmem:[#allocation9 + $0x20] sm:$0xff]  ;;  %v271_v37 = vld [vmem:[#allocation9 + $0x28] sm:$0xff] }
  0x52   :  { %590 = vmatprep.subr.bf16.mxu1 %v766_v0  ;;  %v612_v35 = vpack.c.bf16 %v269_v34, %v268_v32  ;;  %v615_v38 = vpack.c.bf16 %v271_v37, %v270_v36  ;;  %v272_v39 = vld [vmem:[#allocation9 + $0x30] sm:$0xff]  ;;  %v273_v40 = vld [vmem:[#allocation9 + $0x38] sm:$0xff]  ;;  %v274_v42 = vld [vmem:[#allocation9 + $0x40] sm:$0xff] }
  0x53   :  { %610 = vmatpush3.bf16.msra.mxu0 %v609_v33  ;;  %v618_v41 = vpack.c.bf16 %v273_v40, %v272_v39  ;;  %v275_v43 = vld [vmem:[#allocation9 + $0x48] sm:$0xff]  ;;  %v276_v45 = vld [vmem:[#allocation9 + $0x50] sm:$0xff]  ;;  %v277_v46 = vld [vmem:[#allocation9 + $0x58] sm:$0xff] }
  0x54   :  { %611 = vmatprep.subr.bf16.mxu0 %v766_v0  ;;  %v621_v44 = vpack.c.bf16 %v275_v43, %v274_v42  ;;  %v624_v47 = vpack.c.bf16 %v277_v46, %v276_v45  ;;  %v278_v48 = vld [vmem:[#allocation9 + $0x60] sm:$0xff]  ;;  %v279_v49 = vld [vmem:[#allocation9 + $0x68] sm:$0xff]  ;;  %v280_v56 = vld [vmem:[#allocation9 + $0x70] sm:$0xff] }
  0x55   :  { %592 = vmatpush3.bf16.msra.mxu1 %v591_v14  ;;  %v627_v50 = vpack.c.bf16 %v279_v49, %v278_v48  ;;  %v456_v51 = vld [vmem:[%s932_s2] ss:$0 sm:$0xff]  ;;  %v281_v57 = vld [vmem:[#allocation9 + $0x78] sm:$0xff] }
  0x56   :  { %593 = vmatprep.subr.bf16.mxu1 %v766_v0  ;;  %v630_v58 = vpack.c.bf16 %v281_v57, %v280_v56  ;;  %v458_v59 = vld [vmem:[%s934_s4] ss:$0 sm:$0xff] }
  0x57   :  { %613 = vmatpush3.bf16.msra.mxu0 %v612_v35  ;;  %v364_v9 = vld [vmem:[%s937_s7] sm:$0x1] }
  0x58   :  { %614 = vmatprep.subr.bf16.mxu0 %v766_v0 }
  0x59   :  { %595 = vmatpush3.bf16.msra.mxu1 %v594_v17 }
  0x5a   :  { %596 = vmatprep.subr.bf16.mxu1 %v766_v0 }
  0x5b   :  { %616 = vmatpush3.bf16.msra.mxu0 %v615_v38 }
  0x5c   :  { %617 = vmatprep.subr.bf16.mxu0 %v766_v0 }
  0x5d   :  { %598 = vmatpush3.bf16.msra.mxu1 %v597_v20 }
  0x5e   :  { %599 = vmatprep.subr.bf16.mxu1 %v766_v0 }
  0x5f   :  { %619 = vmatpush3.bf16.msra.mxu0 %v618_v41 }
  0x60   :  { %620 = vmatprep.subr.bf16.mxu0 %v766_v0 }
  0x61   :  { %601 = vmatpush3.bf16.msra.mxu1 %v600_v23 }
  0x62   :  { %602 = vmatprep.subr.bf16.mxu1 %v766_v0 }
  0x63   :  { %622 = vmatpush3.bf16.msra.mxu0 %v621_v44 }
  0x64   :  { %623 = vmatprep.subr.bf16.mxu0 %v766_v0 }
  0x65   :  { %604 = vmatpush3.bf16.msra.mxu1 %v603_v26 }
  0x66   :  { %605 = vmatprep.subr.bf16.mxu1 %v766_v0 }
  0x67   :  { %625 = vmatpush3.bf16.msra.mxu0 %v624_v47 }
  0x68   :  { %626 = vmatprep.subr.bf16.mxu0 %v766_v0 }
  0x69   :  { %607 = vmatpush3.bf16.msra.mxu1 %v606_v29 }
  0x6a   :  { %576 = vmatprep.subr.mxu1 %v768_v1 }
  0x6b   :  { %628 = vmatpush3.bf16.msra.mxu0 %v627_v50 }
  0x6c   :  { %629 = vmatprep.subr.bf16.mxu0 %v766_v0  ;;  %v459_v0 = vld [vmem:[%s936_s6] ss:$0 sm:$0xff]  ;;  %s445_s6 = sshll.u32 %s769_s22, 4  ;;  %s446_s6 = int_to_ptr.vmem [resolvable:$true] %s445_s6 }
  0x6d   :  { %s730_s23 = scalar_lea.vmem %s446_s6, 16  ;;  %s734_s25 = scalar_lea.vmem %s446_s6, 32 }
  0x6e   :  { %p731_p4 = scmp.ne.s32.totalorder %s446_s6, %s730_s23  ;;  %p735_p5 = scmp.lt.s32.totalorder %s446_s6, %s446_s6 }
  0x6f   :  { %631 = vmatpush3.bf16.msra.mxu0 %v630_v58  ;;  %p736_p6 = scmp.lt.s32.totalorder %s734_s25, %s730_s23 }
  0x71   :  { %p737_p7 = por %p736_p6, %p735_p5 }
  0x73   :  { %p738_p8 = pnand %p737_p7, %p731_p4 }
 0x123   :  { %v167_v52 = vpop.f32.mrb[0].mxu0 }
 0x124   :  { %v168_v53 = vadd.f32 %v456_v51, %v167_v52  ;;  %v505_v54 = vpop.f32.mrb[1].mxu0 }
 0x126   :  { %v171_v55 = vmax.f32 %v168_v53, 0.0 }
 0x128   :  { %539 = vmatmul.mubr.f32.vlgmr.msra.gmra.mrb[0].mxu1 %v171_v55 }
 0x129   :  { %578 = vmatprep.mubr.msk.f32.mxu1 %vm767_vm0, %v768_v1 }
 0x1fb   :  { %v261_v60 = vpop.f32.mrb[0].mxu1 }
 0x1fc   :  { %v262_v61 = vadd.f32 %v458_v59, %v261_v60  ;;  %v540_v62 = vpop.f32.mrb[1].mxu1 }
 0x1fe   :  { %v265_v63 = vmax.f32 %v262_v61, 0.0 }
 0x200   :  { %574 = vmatmul.mubr.f32.vlgmr.msra.gmra.mrb[2].mxu0 %v265_v63 }
 0x2d3   :  { %v355_v2 = vpop.f32.mrb[2].mxu0 }
 0x2d4   :  { %v356_v3 = vadd.f32 %v459_v0, %v355_v2  ;;  %v575_v1 = vpop.f32.mrb[3].mxu0 }
 0x2d6   :  { %v359_v4 = vadd.f32 3.0, %v356_v3 }
 0x2d8   :  { %v360_v5 = vmax.f32 %v359_v4, 0.0 }
 0x2da   :  { %v361_v6 = vmin.f32 %v360_v5, 6.0 }
 0x2dc   :  { %v362_v7 = vmul.f32 %v361_v6, %v356_v3 }
 0x2de   :  { %v363_v8 = vmul.f32 0.16666667, %v362_v7 }
 0x2e0   :  { %577 = vmatpush3.xpose.msra.mxu1 %v363_v8 }
 0x2e3   :  { %579 = vmatmul.mubr.f32.vlgmr.msra.gmra.mrb[2].mxu1 %v364_v9 }
 0x3b6   :  { %v433_v11 = vpop.f32.mrb[2].mxu1 }
 0x3b7   :  { %v434_v12 = vadd.f32 %v433_v11, %v366_v10  ;;  %v580_v13 = vpop.f32.mrb[3].mxu1 }
 0x3b9   :  { %438 = vst.msk [vmem:[#allocation11] sm:$0x1] %vm437_vm2, %v434_v12 }
 0x3ba   :  { %741 = shalt.err (!%p738_p8)
}
 0x3bb   :  { %s742_s8 = scalar_lea.hbm %s939_s9, 16 }
 0x3bc   :  { %p743_p9 = scmp.ne.s32.totalorder %s939_s9, %s742_s8  ;;  %p746_p10 = scmp.lt.u32.totalorder %s742_s8, %s939_s9 }
 0x3be   :  { %p748_p11 = pnand %p746_p10, %p743_p9 }
 0x3c0   :  { %751 = shalt.err (!%p748_p11)
}
 0x3c1   :  { %448 = dma.vmem_to_hbm [thread:$0]  %s446_s6, 16, %s939_s9, [#allocation5]  }
 0x3c2   :  { %758 = dma.done.wait [#allocation5], 16  }
 0x3c3   :  { %759 = vsyncadd [#allocation5], 4294967280 }
 0x3c4   :  { %452 = vsyncpa [#allocation4], 1 }
 0x3c5   :  { %453 = vsyncpa [#allocation7], 1 }
 0x3c6   :  { %454 = vsyncpa [#allocation10], 1 }
 0x3c7   :  { %455 = vsyncpa [#allocation5], 1 }

// kernel: tpu_custom_call.1
= control target key start
LH: loop header
LB: loop body
LE: loop exit
PB: predicated region body
PF: predicated region fallthrough
CT: control target
= control target key end

     0   :  { %15 = vsyncpa [#allocation4], 0  ;;  %s930_s0 = inlined_call_operand.hbm [shape: f32[8,16], index: 0, kind: input, shape index: {}]   ;;  %s931_s1 = inlined_call_operand.hbm [shape: f32[16,128], index: 1, kind: input, shape index: {}]   ;;  %s932_s2 = inlined_call_operand.vmem [shape: f32[1,128], index: 2, kind: input, shape index: {}]   ;;  %s933_s3 = inlined_call_operand.hbm [shape: f32[128,128], index: 3, kind: input, shape index: {}]   ;;  %s934_s4 = inlined_call_operand.vmem [shape: f32[1,128], index: 4, kind: input, shape index: {}]   ;;  %s935_s5 = inlined_call_operand.hbm [shape: f32[128,128], index: 5, kind: input, shape index: {}]   ;;  %s936_s6 = inlined_call_operand.vmem [shape: f32[1,128], index: 6, kind: input, shape index: {}]   ;;  %s937_s7 = inlined_call_operand.vmem [shape: f32[1,128], index: 7, kind: input, shape index: {}]   ;;  %s938_s8 = inlined_call_operand.<no memory space> [shape: f32[1], index: 8, kind: input, shape index: {}]   ;;  %s939_s9 = inlined_call_operand.hbm [shape: f32[1,8], index: 9, kind: output, shape index: {}]  }
   0x1   :  { %16 = vsyncpa [#allocation7], 0 }
   0x2   :  { %17 = vsyncpa [#allocation10], 0 }
   0x3   :  { %18 = vsyncpa [#allocation5], 0  ;;  %s760_s30 = smov [#allocation6]   ;;  %s642_s13 = scalar_lea.hbm %s931_s1, 256 }
   0x4   :  { %s34_s10 = sshll.u32 %s760_s30, 4  ;;  %p643_p0 = scmp.ne.s32.totalorder %s931_s1, %s642_s13  ;;  %s35_s10 = int_to_ptr.vmem [resolvable:$true] %s34_s10 }
   0x5   :  { %p646_p1 = scmp.lt.u32.totalorder %s642_s13, %s931_s1 }
   0x7   :  { %p648_p2 = pnand %p646_p1, %p643_p0 }
   0x9   :  { %651 = shalt.err (!%p648_p2)
}
   0xa   :  { %s652_s18 = scalar_lea.vmem %s35_s10, 256  ;;  %p657_p4 = scmp.lt.s32.totalorder %s35_s10, %s35_s10 }
   0xb   :  { %p653_p3 = scmp.ne.s32.totalorder %s35_s10, %s652_s18  ;;  %p658_p5 = scmp.lt.s32.totalorder %s652_s18, %s652_s18 }
   0xd   :  { %p659_p6 = por %p658_p5, %p657_p4 }
   0xf   :  { %p660_p7 = pnand %p659_p6, %p653_p3 }
  0x11   :  { %663 = shalt.err (!%p660_p7)
}
  0x12   :  { %s761_s19 = smov 128   ;;  %s762_s20 = smov 8  }
  0x13   :  { %40 = dma.hbm_to_vmem [thread:$0]  %s931_s1, 256, %s35_s10, [#allocation7], %s761_s19, %s761_s19, %s762_s20  }
  0x14   :  { %s763_s23 = smov [#allocation3]   ;;  %s764_s25 = smov [#allocation8]  }
  0x15   :  { %s25_s24 = sshll.u32 %s763_s23, 4  ;;  %s48_s26 = sshll.u32 %s764_s25, 4  ;;  %s26_s24 = int_to_ptr.vmem [resolvable:$true] %s25_s24  ;;  %s49_s26 = int_to_ptr.vmem [resolvable:$true] %s48_s26 }
  0x16   :  { %s664_s29 = scalar_lea.hbm %s930_s0, 128 }
  0x17   :  { %p665_p8 = scmp.ne.s32.totalorder %s930_s0, %s664_s29  ;;  %p668_p9 = scmp.lt.u32.totalorder %s664_s29, %s930_s0 }
  0x19   :  { %p670_p10 = pnand %p668_p9, %p665_p8 }
  0x1b   :  { %673 = shalt.err (!%p670_p10)
}
  0x1c   :  { %s674_s1 = scalar_lea.vmem %s26_s24, 128  ;;  %p679_p12 = scmp.lt.s32.totalorder %s26_s24, %s26_s24 }
  0x1d   :  { %p675_p11 = scmp.ne.s32.totalorder %s26_s24, %s674_s1  ;;  %p680_p13 = scmp.lt.s32.totalorder %s674_s1, %s674_s1 }
  0x1f   :  { %p681_p0 = por %p680_p13, %p679_p12 }
  0x21   :  { %p682_p1 = pnand %p681_p0, %p675_p11 }
  0x23   :  { %685 = shalt.err (!%p682_p1)
}
  0x24   :  { %28 = dma.hbm_to_vmem [thread:$0]  %s930_s0, 128, %s26_s24, [#allocation4]  }
  0x25   :  { %s686_s17 = scalar_lea.hbm %s933_s3, 2048 }
  0x26   :  { %p687_p2 = scmp.ne.s32.totalorder %s933_s3, %s686_s17  ;;  %p690_p3 = scmp.lt.u32.totalorder %s686_s17, %s933_s3 }
  0x28   :  { %p692_p4 = pnand %p690_p3, %p687_p2 }
  0x2a   :  { %695 = shalt.err (!%p692_p4)
}
  0x2b   :  { %s696_s25 = scalar_lea.vmem %s49_s26, 2048  ;;  %p701_p6 = scmp.lt.s32.totalorder %s49_s26, %s49_s26 }
  0x2c   :  { %p697_p5 = scmp.ne.s32.totalorder %s49_s26, %s696_s25  ;;  %p702_p7 = scmp.lt.s32.totalorder %s696_s25, %s696_s25 }
  0x2e   :  { %p703_p8 = por %p702_p7, %p701_p6 }
  0x30   :  { %p704_p9 = pnand %p703_p8, %p697_p5 }
  0x32   :  { %707 = shalt.err (!%p704_p9)
}
  0x33   :  { %54 = dma.hbm_to_vmem [thread:$0]  %s933_s3, 2048, %s49_s26, [#allocation7], %s761_s19, %s761_s19, %s762_s20  }
  0x34   :  { %s765_s27 = smov [#allocation9]   ;;  %s708_s11 = scalar_lea.hbm %s935_s5, 2048 }
  0x35   :  { %s62_s28 = sshll.u32 %s765_s27, 4  ;;  %p709_p10 = scmp.ne.s32.totalorder %s935_s5, %s708_s11  ;;  %s63_s28 = int_to_ptr.vmem [resolvable:$true] %s62_s28 }
  0x36   :  { %p712_p11 = scmp.lt.u32.totalorder %s708_s11, %s935_s5 }
  0x38   :  { %p714_p12 = pnand %p712_p11, %p709_p10 }
  0x3a   :  { %717 = shalt.err (!%p714_p12)
}
  0x3b   :  { %s718_s14 = scalar_lea.vmem %s63_s28, 2048  ;;  %p723_p0 = scmp.lt.s32.totalorder %s63_s28, %s63_s28 }
  0x3c   :  { %p719_p13 = scmp.ne.s32.totalorder %s63_s28, %s718_s14  ;;  %p724_p1 = scmp.lt.s32.totalorder %s718_s14, %s718_s14 }
  0x3e   :  { %p725_p2 = por %p724_p1, %p723_p0 }
  0x40   :  { %p726_p3 = pnand %p725_p2, %p719_p13 }
  0x42   :  { %729 = shalt.err (!%p726_p3)
}
  0x43   :  { %68 = dma.hbm_to_vmem [thread:$0]  %s935_s5, 2048, %s63_s28, [#allocation10], %s761_s19, %s761_s19, %s762_s20  }
  0x44   :  { %752 = dma.done.wait [#allocation4], 128  }
  0x45   :  { %753 = vsyncadd [#allocation4], 4294967168 }
  0x46   :  { %754 = dma.done.wait [#allocation7], 2304  }
  0x47   :  { %755 = vsyncadd [#allocation7], 4294964992 }
  0x48   :  { %756 = dma.done.wait [#allocation10], 2048  }
  0x49   :  { %757 = vsyncadd [#allocation10], 4294965248  ;;  %v766_v0 = vmov 0.0|0.0   ;;  %vm767_vm0 = vmmov 0   ;;  %v768_v1 = vmov 0.0   ;;  %v88_v2 = vld [vmem:[#allocation6] sm:$0xff] }
  0x4a   :  { %581 = vmatprep.subr.bf16.mxu0 %v766_v0  ;;  %503 = vmatprep.mubr.msk.f32.mxu0 %vm767_vm0, %v768_v1  ;;  %v89_v3 = vld [vmem:[#allocation6 + $0x8] sm:$0xff]  ;;  %v172_v5 = vld [vmem:[#allocation8] sm:$0xff]  ;;  %v173_v6 = vld [vmem:[#allocation8 + $0x8] sm:$0xff]  ;;  %vm97_vm1 = vcmask 130048   ;;  %s769_s22 = smov [#allocation11]   ;;  %vm437_vm2 = vcmask 57344  }
  0x4b   :  { %584 = vmatprep.subr.bf16.mxu1 %v766_v0  ;;  %538 = vmatprep.mubr.msk.f32.mxu1 %vm767_vm0, %v768_v1  ;;  %v582_v4 = vpack.c.bf16 %v89_v3, %v88_v2  ;;  %v174_v7 = vld [vmem:[#allocation8 + $0x10] sm:$0xff]  ;;  %v585_v8 = vpack.c.bf16 %v173_v6, %v172_v5  ;;  %v175_v9 = vld [vmem:[#allocation8 + $0x18] sm:$0xff]  ;;  %v87_v10 = vld [vmem:[#allocation3] sm:$0xff] }
  0x4c   :  { %v588_v11 = vpack.c.bf16 %v175_v9, %v174_v7  ;;  %v176_v12 = vld [vmem:[#allocation8 + $0x20] sm:$0xff]  ;;  %v177_v13 = vld [vmem:[#allocation8 + $0x28] sm:$0xff]  ;;  %v178_v15 = vld [vmem:[#allocation8 + $0x30] sm:$0xff] }
  0x4d   :  { %583 = vmatpush3.bf16.msra.mxu0 %v582_v4  ;;  %586 = vmatpush3.bf16.msra.mxu1 %v585_v8  ;;  %v591_v14 = vpack.c.bf16 %v177_v13, %v176_v12  ;;  %v179_v16 = vld [vmem:[#allocation8 + $0x38] sm:$0xff]  ;;  %v180_v18 = vld [vmem:[#allocation8 + $0x40] sm:$0xff]  ;;  %v181_v19 = vld [vmem:[#allocation8 + $0x48] sm:$0xff] }
  0x4e   :  { %608 = vmatprep.subr.bf16.mxu0 %v766_v0  ;;  %587 = vmatprep.subr.bf16.mxu1 %v766_v0  ;;  %v594_v17 = vpack.c.bf16 %v179_v16, %v178_v15  ;;  %v597_v20 = vpack.c.bf16 %v181_v19, %v180_v18  ;;  %v182_v21 = vld [vmem:[#allocation8 + $0x50] sm:$0xff]  ;;  %v183_v22 = vld [vmem:[#allocation8 + $0x58] sm:$0xff]  ;;  %v184_v24 = vld [vmem:[#allocation8 + $0x60] sm:$0xff] }
  0x4f   :  { %v600_v23 = vpack.c.bf16 %v183_v22, %v182_v21  ;;  %v185_v25 = vld [vmem:[#allocation8 + $0x68] sm:$0xff]  ;;  %v186_v27 = vld [vmem:[#allocation8 + $0x70] sm:$0xff]  ;;  %v187_v28 = vld [vmem:[#allocation8 + $0x78] sm:$0xff] }
  0x50   :  { %504 = vmatmul.mubr.msk.f32.vlgmr.msra.gmra.mrb[0].mxu0 %vm97_vm1, %v87_v10  ;;  %v603_v26 = vpack.c.bf16 %v185_v25, %v184_v24  ;;  %v606_v29 = vpack.c.bf16 %v187_v28, %v186_v27  ;;  %v266_v30 = vld [vmem:[#allocation9] sm:$0xff]  ;;  %v267_v31 = vld [vmem:[#allocation9 + $0x8] sm:$0xff]  ;;  %v268_v32 = vld [vmem:[#allocation9 + $0x10] sm:$0xff]  ;;  %v366_v10 = vstv %s938_s8 }
  0x51   :  { %573 = vmatprep.mubr.msk.f32.mxu0 %vm767_vm0, %v768_v1  ;;  %589 = vmatpush3.bf16.msra.mxu1 %v588_v11  ;;  %v609_v33 = vpack.c.bf16 %v267_v31, %v266_v30  ;;  %v269_v34 = vld [vmem:[#allocation9 + $0x18] sm:$0xff]  ;;  %v270_v36 = vld [vmem:[#allocation9 + $0x20] sm:$0xff]  ;;  %v271_v37 = vld [vmem:[#allocation9 + $0x28] sm:$0xff] }
  0x52   :  { %590 = vmatprep.subr.bf16.mxu1 %v766_v0  ;;  %v612_v35 = vpack.c.bf16 %v269_v34, %v268_v32  ;;  %v615_v38 = vpack.c.bf16 %v271_v37, %v270_v36  ;;  %v272_v39 = vld [vmem:[#allocation9 + $0x30] sm:$0xff]  ;;  %v273_v40 = vld [vmem:[#allocation9 + $0x38] sm:$0xff]  ;;  %v274_v42 = vld [vmem:[#allocation9 + $0x40] sm:$0xff] }
  0x53   :  { %610 = vmatpush3.bf16.msra.mxu0 %v609_v33  ;;  %v618_v41 = vpack.c.bf16 %v273_v40, %v272_v39  ;;  %v275_v43 = vld [vmem:[#allocation9 + $0x48] sm:$0xff]  ;;  %v276_v45 = vld [vmem:[#allocation9 + $0x50] sm:$0xff]  ;;  %v277_v46 = vld [vmem:[#allocation9 + $0x58] sm:$0xff] }
  0x54   :  { %611 = vmatprep.subr.bf16.mxu0 %v766_v0  ;;  %v621_v44 = vpack.c.bf16 %v275_v43, %v274_v42  ;;  %v624_v47 = vpack.c.bf16 %v277_v46, %v276_v45  ;;  %v278_v48 = vld [vmem:[#allocation9 + $0x60] sm:$0xff]  ;;  %v279_v49 = vld [vmem:[#allocation9 + $0x68] sm:$0xff]  ;;  %v280_v56 = vld [vmem:[#allocation9 + $0x70] sm:$0xff] }
  0x55   :  { %592 = vmatpush3.bf16.msra.mxu1 %v591_v14  ;;  %v627_v50 = vpack.c.bf16 %v279_v49, %v278_v48  ;;  %v456_v51 = vld [vmem:[%s932_s2] ss:$0 sm:$0xff]  ;;  %v281_v57 = vld [vmem:[#allocation9 + $0x78] sm:$0xff] }
  0x56   :  { %593 = vmatprep.subr.bf16.mxu1 %v766_v0  ;;  %v630_v58 = vpack.c.bf16 %v281_v57, %v280_v56  ;;  %v458_v59 = vld [vmem:[%s934_s4] ss:$0 sm:$0xff] }
  0x57   :  { %613 = vmatpush3.bf16.msra.mxu0 %v612_v35  ;;  %v364_v9 = vld [vmem:[%s937_s7] sm:$0x1] }
  0x58   :  { %614 = vmatprep.subr.bf16.mxu0 %v766_v0 }
  0x59   :  { %595 = vmatpush3.bf16.msra.mxu1 %v594_v17 }
  0x5a   :  { %596 = vmatprep.subr.bf16.mxu1 %v766_v0 }
  0x5b   :  { %616 = vmatpush3.bf16.msra.mxu0 %v615_v38 }
  0x5c   :  { %617 = vmatprep.subr.bf16.mxu0 %v766_v0 }
  0x5d   :  { %598 = vmatpush3.bf16.msra.mxu1 %v597_v20 }
  0x5e   :  { %599 = vmatprep.subr.bf16.mxu1 %v766_v0 }
  0x5f   :  { %619 = vmatpush3.bf16.msra.mxu0 %v618_v41 }
  0x60   :  { %620 = vmatprep.subr.bf16.mxu0 %v766_v0 }
  0x61   :  { %601 = vmatpush3.bf16.msra.mxu1 %v600_v23 }
  0x62   :  { %602 = vmatprep.subr.bf16.mxu1 %v766_v0 }
  0x63   :  { %622 = vmatpush3.bf16.msra.mxu0 %v621_v44 }
  0x64   :  { %623 = vmatprep.subr.bf16.mxu0 %v766_v0 }
  0x65   :  { %604 = vmatpush3.bf16.msra.mxu1 %v603_v26 }
  0x66   :  { %605 = vmatprep.subr.bf16.mxu1 %v766_v0 }
  0x67   :  { %625 = vmatpush3.bf16.msra.mxu0 %v624_v47 }
  0x68   :  { %626 = vmatprep.subr.bf16.mxu0 %v766_v0 }
  0x69   :  { %607 = vmatpush3.bf16.msra.mxu1 %v606_v29 }
  0x6a   :  { %576 = vmatprep.subr.mxu1 %v768_v1 }
  0x6b   :  { %628 = vmatpush3.bf16.msra.mxu0 %v627_v50 }
  0x6c   :  { %629 = vmatprep.subr.bf16.mxu0 %v766_v0  ;;  %v459_v0 = vld [vmem:[%s936_s6] ss:$0 sm:$0xff]  ;;  %s445_s6 = sshll.u32 %s769_s22, 4  ;;  %s446_s6 = int_to_ptr.vmem [resolvable:$true] %s445_s6 }
  0x6d   :  { %s730_s23 = scalar_lea.vmem %s446_s6, 16  ;;  %s734_s25 = scalar_lea.vmem %s446_s6, 32 }
  0x6e   :  { %p731_p4 = scmp.ne.s32.totalorder %s446_s6, %s730_s23  ;;  %p735_p5 = scmp.lt.s32.totalorder %s446_s6, %s446_s6 }
  0x6f   :  { %631 = vmatpush3.bf16.msra.mxu0 %v630_v58  ;;  %p736_p6 = scmp.lt.s32.totalorder %s734_s25, %s730_s23 }
  0x71   :  { %p737_p7 = por %p736_p6, %p735_p5 }
  0x73   :  { %p738_p8 = pnand %p737_p7, %p731_p4 }
 0x123   :  { %v167_v52 = vpop.f32.mrb[0].mxu0 }
 0x124   :  { %v168_v53 = vadd.f32 %v456_v51, %v167_v52  ;;  %v505_v54 = vpop.f32.mrb[1].mxu0 }
 0x126   :  { %v171_v55 = vmax.f32 %v168_v53, 0.0 }
 0x128   :  { %539 = vmatmul.mubr.f32.vlgmr.msra.gmra.mrb[0].mxu1 %v171_v55 }
 0x129   :  { %578 = vmatprep.mubr.msk.f32.mxu1 %vm767_vm0, %v768_v1 }
 0x1fb   :  { %v261_v60 = vpop.f32.mrb[0].mxu1 }
 0x1fc   :  { %v262_v61 = vadd.f32 %v458_v59, %v261_v60  ;;  %v540_v62 = vpop.f32.mrb[1].mxu1 }
 0x1fe   :  { %v265_v63 = vmax.f32 %v262_v61, 0.0 }
 0x200   :  { %574 = vmatmul.mubr.f32.vlgmr.msra.gmra.mrb[2].mxu0 %v265_v63 }
 0x2d3   :  { %v355_v2 = vpop.f32.mrb[2].mxu0 }
 0x2d4   :  { %v356_v3 = vadd.f32 %v459_v0, %v355_v2  ;;  %v575_v1 = vpop.f32.mrb[3].mxu0 }
 0x2d6   :  { %v359_v4 = vadd.f32 3.0, %v356_v3 }
 0x2d8   :  { %v360_v5 = vmax.f32 %v359_v4, 0.0 }
 0x2da   :  { %v361_v6 = vmin.f32 %v360_v5, 6.0 }
 0x2dc   :  { %v362_v7 = vmul.f32 %v361_v6, %v356_v3 }
 0x2de   :  { %v363_v8 = vmul.f32 0.16666667, %v362_v7 }
 0x2e0   :  { %577 = vmatpush3.xpose.msra.mxu1 %v363_v8 }
 0x2e3   :  { %579 = vmatmul.mubr.f32.vlgmr.msra.gmra.mrb[2].mxu1 %v364_v9 }
 0x3b6   :  { %v433_v11 = vpop.f32.mrb[2].mxu1 }
 0x3b7   :  { %v434_v12 = vadd.f32 %v433_v11, %v366_v10  ;;  %v580_v13 = vpop.f32.mrb[3].mxu1 }
 0x3b9   :  { %438 = vst.msk [vmem:[#allocation11] sm:$0x1] %vm437_vm2, %v434_v12 }
 0x3ba   :  { %741 = shalt.err (!%p738_p8)
}
 0x3bb   :  { %s742_s8 = scalar_lea.hbm %s939_s9, 16 }
 0x3bc   :  { %p743_p9 = scmp.ne.s32.totalorder %s939_s9, %s742_s8  ;;  %p746_p10 = scmp.lt.u32.totalorder %s742_s8, %s939_s9 }
 0x3be   :  { %p748_p11 = pnand %p746_p10, %p743_p9 }
 0x3c0   :  { %751 = shalt.err (!%p748_p11)
}
 0x3c1   :  { %448 = dma.vmem_to_hbm [thread:$0]  %s446_s6, 16, %s939_s9, [#allocation5]  }
 0x3c2   :  { %758 = dma.done.wait [#allocation5], 16  }
 0x3c3   :  { %759 = vsyncadd [#allocation5], 4294967280 }
 0x3c4   :  { %452 = vsyncpa [#allocation4], 1 }
 0x3c5   :  { %453 = vsyncpa [#allocation7], 1 }
 0x3c6   :  { %454 = vsyncpa [#allocation10], 1 }
 0x3c7   :  { %455 = vsyncpa [#allocation5], 1 }

</bundles_post_ra>
